<compile_context>
chip_gen: v6e
topology: v6e:2x2x1
jax: 0.10.0
libtpu: 0.0.40
codegen_flags: <defaults>
</compile_context>

<pallas_src>
import math

import jax
import jax.numpy as jnp
from jax.experimental import pallas as pl
from jax.experimental.pallas import tpu as pltpu

HIDDEN = 256
OUT_PAD = 128           # lane-dense padded width for the final (B, 1) output
DEFAULT_TILE_B = 2048   # batch rows per grid step (multiple of 8)


def q_mlp_kernel(s_ref, a_ref, w1s_ref, w1a_ref, b1_ref, w2_ref, b2_ref,
                 w3_ref, b3_ref, o_ref):
    # One batch tile of the whole 3-layer MLP: three MXU passes + VPU bias/ReLU.
    s = s_ref[...].astype(jnp.bfloat16)
    a = a_ref[...].astype(jnp.bfloat16)

    # Layer 1 (concat folded into two small matmuls on the same VMEM tiles).
    h1 = (jnp.dot(s, w1s_ref[...], preferred_element_type=jnp.float32)
          + jnp.dot(a, w1a_ref[...], preferred_element_type=jnp.float32)
          + b1_ref[...])
    h1 = jnp.maximum(h1, 0.0).astype(jnp.bfloat16)

    # Layer 2.
    h2 = jnp.dot(h1, w2_ref[...], preferred_element_type=jnp.float32) + b2_ref[...]
    h2 = jnp.maximum(h2, 0.0).astype(jnp.bfloat16)

    # Layer 3 (output padded to 128 lanes -> unmasked, lane-dense store; bf16 slab
    # halves the HBM writeback relative to f32).
    out = jnp.dot(h2, w3_ref[...], preferred_element_type=jnp.float32) + b3_ref[...]
    o_ref[...] = out.astype(o_ref.dtype)


def init_q_params(key, n_state, action_dim, hidden=HIDDEN, out_pad=OUT_PAD,
                  w_dtype=jnp.bfloat16):
    """Mirrors PyTorch nn.Linear default init (U(-1/sqrt(fan_in), 1/sqrt(fan_in))).

    Layout choices done ONCE at init (not per call):
      * weights stored (in_features, out_features) so y = x @ W + b
      * W1 split into state / action halves (removes the wrapper concat)
      * W3/b3 zero-padded from 1 -> OUT_PAD output columns (lane-dense store)
      * weights cast to bf16 (intentional tradeoff); biases kept f32
    """
    k1w, k1b, k2w, k2b, k3w, k3b = jax.random.split(key, 6)

    def lin(kw, kb, fan_in, fan_out):
        bound = 1.0 / math.sqrt(fan_in)
        w = jax.random.uniform(kw, (fan_in, fan_out), jnp.float32, -bound, bound)
        b = jax.random.uniform(kb, (1, fan_out), jnp.float32, -bound, bound)
        return w, b

    w1, b1 = lin(k1w, k1b, n_state + action_dim, hidden)
    w2, b2 = lin(k2w, k2b, hidden, hidden)
    w3, b3 = lin(k3w, k3b, hidden, 1)

    w1s, w1a = w1[:n_state], w1[n_state:]
    w3p = jnp.zeros((hidden, out_pad), jnp.float32).at[:, :1].set(w3)
    b3p = jnp.zeros((1, out_pad), jnp.float32).at[:, :1].set(b3)

    return (w1s.astype(w_dtype), w1a.astype(w_dtype), b1,
            w2.astype(w_dtype), b2,
            w3p.astype(w_dtype), b3p)


def q_forward_padded(state, action, params, *, tile_b=DEFAULT_TILE_B):
    """Runs the fused MLP kernel and returns the raw lane-dense (B, OUT_PAD) bf16
    slab; the Q-value is column 0.  Consumers that can fuse the column-0 read
    (e.g. a loss) should take this directly to avoid an extra HBM pass."""
    B, n_state = state.shape
    action_dim = action.shape[1]
    w1s, w1a, b1, w2, b2, w3, b3 = params
    H = w2.shape[0]
    out_pad = w3.shape[1]

    # Batch tile: whole batch if it fits in one tile (block == full dim is always
    # legal), otherwise a 2048-row tile (multiple of 8).  Last partial block is
    # handled by Pallas (rows independent, OOB writes masked).  VMEM at tb=2048:
    # ~1.7 MB double-buffered I/O + ~4 MB f32 intermediates -> well under limits.
    tb = B if B <= tile_b else tile_b
    grid = (pl.cdiv(B, tb),)

    resident = lambda i: (0, 0)   # same block every step -> fetched once, stays in VMEM
    batched = lambda i: (i, 0)

    return pl.pallas_call(
        q_mlp_kernel,
        out_shape=jax.ShapeDtypeStruct((B, out_pad), jnp.bfloat16),
        grid=grid,
        in_specs=[
            pl.BlockSpec((tb, n_state), batched),      # state tile
            pl.BlockSpec((tb, action_dim), batched),   # action tile
            pl.BlockSpec((n_state, H), resident),      # w1 (state rows)
            pl.BlockSpec((action_dim, H), resident),   # w1 (action rows)
            pl.BlockSpec((1, H), resident),            # b1
            pl.BlockSpec((H, H), resident),            # w2
            pl.BlockSpec((1, H), resident),            # b2
            pl.BlockSpec((H, out_pad), resident),      # w3 (padded)
            pl.BlockSpec((1, out_pad), resident),      # b3 (padded)
        ],
        out_specs=pl.BlockSpec((tb, out_pad), batched),
        compiler_params=pltpu.CompilerParams(
            dimension_semantics=("parallel",)),        # 2 TCs on v7x; no-op on v5e/v6e
    )(state, action, w1s, w1a, b1, w2, b2, w3, b3)


def q_forward(state, action, params, *, tile_b=DEFAULT_TILE_B):
    """Module-equivalent forward: returns (B, 1) float32 Q values."""
    out = q_forward_padded(state, action, params, tile_b=tile_b)
    return out[:, :1].astype(jnp.float32)


def q_forward_ref(state, action, params):
    """Pure-JAX reference mirroring the kernel's mixed precision (bf16 operands,
    f32 accumulate, bf16 output slab)."""
    w1s, w1a, b1, w2, b2, w3, b3 = params
    s = state.astype(jnp.bfloat16)
    a = action.astype(jnp.bfloat16)
    h1 = (jnp.dot(s, w1s, preferred_element_type=jnp.float32)
          + jnp.dot(a, w1a, preferred_element_type=jnp.float32) + b1)
    h1 = jnp.maximum(h1, 0.0).astype(jnp.bfloat16)
    h2 = jnp.dot(h1, w2, preferred_element_type=jnp.float32) + b2
    h2 = jnp.maximum(h2, 0.0).astype(jnp.bfloat16)
    out = jnp.dot(h2, w3, preferred_element_type=jnp.float32) + b3
    return out[:, :1].astype(jnp.bfloat16).astype(jnp.float32)


if __name__ == "__main__":
    n_state, action_dim, batch = 24, 8, 8

    key = jax.random.PRNGKey(0)
    k_params, k_state, k_action = jax.random.split(key, 3)

    params = init_q_params(k_params, n_state, action_dim)
    state = jax.random.normal(k_state, (batch, n_state), jnp.float32)
    action = jax.random.normal(k_action, (batch, action_dim), jnp.float32)

    out = jax.block_until_ready(q_forward(state, action, params))
    ref = q_forward_ref(state, action, params)

    assert out.shape == (batch, 1), out.shape
    assert jnp.allclose(out, ref, atol=2e-2, rtol=2e-2), (out, ref)

    print("KERNEL_OK")
</pallas_src>

<mosaic_0001>
module attributes {stable_mosaic.version = 11 : i64} {
  func.func @q_mlp_kernel(%arg0: i32, %arg1: memref<8x24xf32, #tpu.memory_space<vmem>>, %arg2: memref<8x8xf32, #tpu.memory_space<vmem>>, %arg3: memref<24x256xbf16, #tpu.memory_space<vmem>>, %arg4: memref<8x256xbf16, #tpu.memory_space<vmem>>, %arg5: memref<1x256xf32, #tpu.memory_space<vmem>>, %arg6: memref<256x256xbf16, #tpu.memory_space<vmem>>, %arg7: memref<1x256xf32, #tpu.memory_space<vmem>>, %arg8: memref<256x128xbf16, #tpu.memory_space<vmem>>, %arg9: memref<1x128xf32, #tpu.memory_space<vmem>>, %arg10: memref<8x128xbf16, #tpu.memory_space<vmem>>) attributes {dimension_semantics = [#tpu.dimension_semantics<parallel>], iteration_bounds = array<i64: 1>, scalar_prefetch = 0 : i64, scratch_operands = 0 : i64, tpu.core_type = #tpu.core_type<tc>, window_params = [{transform_indices = @transform_0, window_bounds = array<i64: 8, 24>}, {transform_indices = @transform_1, window_bounds = array<i64: 8, 8>}, {pipeline_mode = #tpu.pipeline_mode<synchronous>, transform_indices = @transform_2, window_bounds = array<i64: 24, 256>}, {pipeline_mode = #tpu.pipeline_mode<synchronous>, transform_indices = @transform_3, window_bounds = array<i64: 8, 256>}, {pipeline_mode = #tpu.pipeline_mode<synchronous>, transform_indices = @transform_4, window_bounds = array<i64: 1, 256>}, {pipeline_mode = #tpu.pipeline_mode<synchronous>, transform_indices = @transform_5, window_bounds = array<i64: 256, 256>}, {pipeline_mode = #tpu.pipeline_mode<synchronous>, transform_indices = @transform_6, window_bounds = array<i64: 1, 256>}, {pipeline_mode = #tpu.pipeline_mode<synchronous>, transform_indices = @transform_7, window_bounds = array<i64: 256, 128>}, {pipeline_mode = #tpu.pipeline_mode<synchronous>, transform_indices = @transform_8, window_bounds = array<i64: 1, 128>}, {transform_indices = @transform_9, window_bounds = array<i64: 8, 128>}]} {
    %c0 = arith.constant 0 : index
    %c0_0 = arith.constant 0 : index
    %0 = vector.load %arg1[%c0, %c0_0] : memref<8x24xf32, #tpu.memory_space<vmem>>, vector<8x24xf32>
    %1 = arith.truncf %0 : vector<8x24xf32> to vector<8x24xbf16>
    %c0_1 = arith.constant 0 : index
    %c0_2 = arith.constant 0 : index
    %2 = vector.load %arg2[%c0_1, %c0_2] : memref<8x8xf32, #tpu.memory_space<vmem>>, vector<8x8xf32>
    %3 = arith.truncf %2 : vector<8x8xf32> to vector<8x8xbf16>
    %c0_3 = arith.constant 0 : index
    %c0_4 = arith.constant 0 : index
    %4 = vector.load %arg3[%c0_3, %c0_4] : memref<24x256xbf16, #tpu.memory_space<vmem>>, vector<24x256xbf16>
    %cst = arith.constant dense<0.000000e+00> : vector<8x256xf32>
    %5 = tpu.matmul %1, %4, %cst {dimension_numbers = #tpu.dot_dimension_numbers<[1], [0], [0], [1], [0, 0, 1, 1], [], []>} : vector<8x24xbf16>, vector<24x256xbf16>, vector<8x256xf32> -> vector<8x256xf32>
    %c0_5 = arith.constant 0 : index
    %c0_6 = arith.constant 0 : index
    %6 = vector.load %arg4[%c0_5, %c0_6] : memref<8x256xbf16, #tpu.memory_space<vmem>>, vector<8x256xbf16>
    %cst_7 = arith.constant dense<0.000000e+00> : vector<8x256xf32>
    %7 = tpu.matmul %3, %6, %cst_7 {dimension_numbers = #tpu.dot_dimension_numbers<[1], [0], [0], [1], [0, 0, 1, 1], [], []>} : vector<8x8xbf16>, vector<8x256xbf16>, vector<8x256xf32> -> vector<8x256xf32>
    %8 = arith.addf %5, %7 : vector<8x256xf32>
    %c0_8 = arith.constant 0 : index
    %c0_9 = arith.constant 0 : index
    %9 = vector.load %arg5[%c0_8, %c0_9] : memref<1x256xf32, #tpu.memory_space<vmem>>, vector<1x256xf32>
    %10 = vector.broadcast %9 : vector<1x256xf32> to vector<8x256xf32>
    %11 = arith.addf %8, %10 : vector<8x256xf32>
    %cst_10 = arith.constant 0.000000e+00 : f32
    %12 = vector.broadcast %cst_10 : f32 to vector<8x256xf32>
    %13 = arith.maximumf %11, %12 : vector<8x256xf32>
    %14 = arith.truncf %13 : vector<8x256xf32> to vector<8x256xbf16>
    %c0_11 = arith.constant 0 : index
    %c0_12 = arith.constant 0 : index
    %15 = vector.load %arg6[%c0_11, %c0_12] : memref<256x256xbf16, #tpu.memory_space<vmem>>, vector<256x256xbf16>
    %cst_13 = arith.constant dense<0.000000e+00> : vector<8x256xf32>
    %16 = tpu.matmul %14, %15, %cst_13 {dimension_numbers = #tpu.dot_dimension_numbers<[1], [0], [0], [1], [0, 0, 1, 1], [], []>} : vector<8x256xbf16>, vector<256x256xbf16>, vector<8x256xf32> -> vector<8x256xf32>
    %c0_14 = arith.constant 0 : index
    %c0_15 = arith.constant 0 : index
    %17 = vector.load %arg7[%c0_14, %c0_15] : memref<1x256xf32, #tpu.memory_space<vmem>>, vector<1x256xf32>
    %18 = vector.broadcast %17 : vector<1x256xf32> to vector<8x256xf32>
    %19 = arith.addf %16, %18 : vector<8x256xf32>
    %cst_16 = arith.constant 0.000000e+00 : f32
    %20 = vector.broadcast %cst_16 : f32 to vector<8x256xf32>
    %21 = arith.maximumf %19, %20 : vector<8x256xf32>
    %22 = arith.truncf %21 : vector<8x256xf32> to vector<8x256xbf16>
    %c0_17 = arith.constant 0 : index
    %c0_18 = arith.constant 0 : index
    %23 = vector.load %arg8[%c0_17, %c0_18] : memref<256x128xbf16, #tpu.memory_space<vmem>>, vector<256x128xbf16>
    %cst_19 = arith.constant dense<0.000000e+00> : vector<8x128xf32>
    %24 = tpu.matmul %22, %23, %cst_19 {dimension_numbers = #tpu.dot_dimension_numbers<[1], [0], [0], [1], [0, 0, 1, 1], [], []>} : vector<8x256xbf16>, vector<256x128xbf16>, vector<8x128xf32> -> vector<8x128xf32>
    %c0_20 = arith.constant 0 : index
    %c0_21 = arith.constant 0 : index
    %25 = vector.load %arg9[%c0_20, %c0_21] : memref<1x128xf32, #tpu.memory_space<vmem>>, vector<1x128xf32>
    %26 = vector.broadcast %25 : vector<1x128xf32> to vector<8x128xf32>
    %27 = arith.addf %24, %26 : vector<8x128xf32>
    %28 = arith.truncf %27 : vector<8x128xf32> to vector<8x128xbf16>
    %c0_22 = arith.constant 0 : index
    %c0_23 = arith.constant 0 : index
    %29 = vector.load %arg10[%c0_22, %c0_23] : memref<8x128xbf16, #tpu.memory_space<vmem>>, vector<8x128xbf16>
    tpu.vector_store %arg10[%c0_22, %c0_23], %28 {strides = array<i32>} : memref<8x128xbf16, #tpu.memory_space<vmem>>, vector<8x128xbf16>,
    return
  }
  func.func @transform_0(%arg0: i32) -> (i32, i32) {
    %c0_i32 = arith.constant 0 : i32
    %c0_i32_0 = arith.constant 0 : i32
    return %arg0, %c0_i32 : i32, i32
  }
  func.func @transform_1(%arg0: i32) -> (i32, i32) {
    %c0_i32 = arith.constant 0 : i32
    %c0_i32_0 = arith.constant 0 : i32
    return %arg0, %c0_i32 : i32, i32
  }
  func.func @transform_2(%arg0: i32) -> (i32, i32) {
    %c0_i32 = arith.constant 0 : i32
    %c0_i32_0 = arith.constant 0 : i32
    %c0_i32_1 = arith.constant 0 : i32
    return %c0_i32, %c0_i32_0 : i32, i32
  }
  func.func @transform_3(%arg0: i32) -> (i32, i32) {
    %c0_i32 = arith.constant 0 : i32
    %c0_i32_0 = arith.constant 0 : i32
    %c0_i32_1 = arith.constant 0 : i32
    return %c0_i32, %c0_i32_0 : i32, i32
  }
  func.func @transform_4(%arg0: i32) -> (i32, i32) {
    %c0_i32 = arith.constant 0 : i32
    %c0_i32_0 = arith.constant 0 : i32
    %c0_i32_1 = arith.constant 0 : i32
    return %c0_i32, %c0_i32_0 : i32, i32
  }
  func.func @transform_5(%arg0: i32) -> (i32, i32) {
    %c0_i32 = arith.constant 0 : i32
    %c0_i32_0 = arith.constant 0 : i32
    %c0_i32_1 = arith.constant 0 : i32
    return %c0_i32, %c0_i32_0 : i32, i32
  }
  func.func @transform_6(%arg0: i32) -> (i32, i32) {
    %c0_i32 = arith.constant 0 : i32
    %c0_i32_0 = arith.constant 0 : i32
    %c0_i32_1 = arith.constant 0 : i32
    return %c0_i32, %c0_i32_0 : i32, i32
  }
  func.func @transform_7(%arg0: i32) -> (i32, i32) {
    %c0_i32 = arith.constant 0 : i32
    %c0_i32_0 = arith.constant 0 : i32
    %c0_i32_1 = arith.constant 0 : i32
    return %c0_i32, %c0_i32_0 : i32, i32
  }
  func.func @transform_8(%arg0: i32) -> (i32, i32) {
    %c0_i32 = arith.constant 0 : i32
    %c0_i32_0 = arith.constant 0 : i32
    %c0_i32_1 = arith.constant 0 : i32
    return %c0_i32, %c0_i32_0 : i32, i32
  }
  func.func @transform_9(%arg0: i32) -> (i32, i32) {
    %c0_i32 = arith.constant 0 : i32
    %c0_i32_0 = arith.constant 0 : i32
    return %arg0, %c0_i32 : i32, i32
  }
}

</mosaic_0001>

<bundles_post_ra>
// kernel: tpu_custom_call.1
= control target key start
LH: loop header
LB: loop body
LE: loop exit
PB: predicated region body
PF: predicated region fallthrough
CT: control target
= control target key end

     0   :  { %14 = vsyncpa [#allocation3], 0  ;;  %s1113_s0 = inlined_call_operand.hbm [shape: f32[8,24], index: 0, kind: input, shape index: {}]   ;;  %s1114_s1 = inlined_call_operand.hbm [shape: f32[8,8], index: 1, kind: input, shape index: {}]   ;;  %s1115_s2 = inlined_call_operand.hbm [shape: bf16[24,256], index: 2, kind: input, shape index: {}]   ;;  %s1116_s3 = inlined_call_operand.hbm [shape: bf16[8,256], index: 3, kind: input, shape index: {}]   ;;  %s1117_s4 = inlined_call_operand.vmem [shape: f32[1,256], index: 4, kind: input, shape index: {}]   ;;  %s1118_s5 = inlined_call_operand.hbm [shape: bf16[256,256], index: 5, kind: input, shape index: {}]   ;;  %s1119_s6 = inlined_call_operand.vmem [shape: f32[1,256], index: 6, kind: input, shape index: {}]   ;;  %s1120_s7 = inlined_call_operand.hbm [shape: bf16[256,128], index: 7, kind: input, shape index: {}]   ;;  %s1121_s8 = inlined_call_operand.vmem [shape: f32[1,128], index: 8, kind: input, shape index: {}]   ;;  %s1122_s9 = inlined_call_operand.hbm [shape: bf16[8,128], index: 9, kind: output, shape index: {}]  }
   0x1   :  { %15 = vsyncpa [#allocation6], 0 }
   0x2   :  { %16 = vsyncpa [#allocation9], 0 }
   0x3   :  { %17 = vsyncpa [#allocation12], 0 }
   0x4   :  { %18 = vsyncpa [#allocation4], 0  ;;  %s1017_s30 = smov [#allocation5]   ;;  %s1018_s11 = smov [#allocation8]  }
   0x5   :  { %s35_s10 = sshll.u32 %s1017_s30, 4  ;;  %s57_s12 = sshll.u32 %s1018_s11, 4  ;;  %s36_s10 = int_to_ptr.vmem [resolvable:$true] %s35_s10  ;;  %s58_s12 = int_to_ptr.vmem [resolvable:$true] %s57_s12 }
   0x6   :  { %s875_s13 = scalar_lea.vmem %s36_s10, 128  ;;  %p880_p1 = scmp.lt.s32.totalorder %s36_s10, %s36_s10 }
   0x7   :  { %p876_p0 = scmp.ne.s32.totalorder %s36_s10, %s875_s13  ;;  %p881_p2 = scmp.lt.s32.totalorder %s875_s13, %s875_s13 }
   0x9   :  { %p882_p3 = por %p881_p2, %p880_p1 }
   0xb   :  { %p883_p4 = pnand %p882_p3, %p876_p0 }
   0xd   :  { %886 = shalt.err (!%p883_p4)
}
   0xe   :  { %38 = dma.hbm_to_vmem [thread:$0]  %s1114_s1, 128, %s36_s10, [#allocation6]  }
   0xf   :  { %s895_s16 = scalar_lea.vmem %s58_s12, 128  ;;  %p900_p6 = scmp.lt.s32.totalorder %s58_s12, %s58_s12 }
  0x10   :  { %p896_p5 = scmp.ne.s32.totalorder %s58_s12, %s895_s16  ;;  %p901_p7 = scmp.lt.s32.totalorder %s895_s16, %s895_s16 }
  0x12   :  { %p902_p8 = por %p901_p7, %p900_p6 }
  0x14   :  { %p903_p9 = pnand %p902_p8, %p896_p5 }
  0x16   :  { %906 = shalt.err (!%p903_p9)
}
  0x17   :  { %60 = dma.hbm_to_vmem [thread:$0]  %s1116_s3, 128, %s58_s12, [#allocation9]  }
  0x18   :  { %s1019_s19 = smov [#allocation2]   ;;  %s1020_s21 = smov [#allocation7]  }
  0x19   :  { %s25_s20 = sshll.u32 %s1019_s19, 4  ;;  %s44_s22 = sshll.u32 %s1020_s21, 4  ;;  %s26_s20 = int_to_ptr.vmem [resolvable:$true] %s25_s20  ;;  %s45_s22 = int_to_ptr.vmem [resolvable:$true] %s44_s22 }
  0x1a   :  { %s915_s23 = scalar_lea.vmem %s26_s20, 128  ;;  %p920_p11 = scmp.lt.s32.totalorder %s26_s20, %s26_s20 }
  0x1b   :  { %p916_p10 = scmp.ne.s32.totalorder %s26_s20, %s915_s23  ;;  %p921_p12 = scmp.lt.s32.totalorder %s915_s23, %s915_s23 }
  0x1d   :  { %p922_p13 = por %p921_p12, %p920_p11 }
  0x1f   :  { %p923_p0 = pnand %p922_p13, %p916_p10 }
  0x21   :  { %926 = shalt.err (!%p923_p0)
}
  0x22   :  { %28 = dma.hbm_to_vmem [thread:$0]  %s1113_s0, 128, %s26_s20, [#allocation3]  }
  0x23   :  { %s935_s25 = scalar_lea.vmem %s45_s22, 384  ;;  %p940_p2 = scmp.lt.s32.totalorder %s45_s22, %s45_s22 }
  0x24   :  { %p936_p1 = scmp.ne.s32.totalorder %s45_s22, %s935_s25  ;;  %p941_p3 = scmp.lt.s32.totalorder %s935_s25, %s935_s25 }
  0x26   :  { %p942_p4 = por %p941_p3, %p940_p2 }
  0x28   :  { %p943_p5 = pnand %p942_p4, %p936_p1 }
  0x2a   :  { %946 = shalt.err (!%p943_p5)
}
  0x2b   :  { %s1021_s3 = smov 128   ;;  %s1022_s26 = smov 8  }
  0x2c   :  { %50 = dma.hbm_to_vmem [thread:$0]  %s1115_s2, 384, %s45_s22, [#allocation6], %s1021_s3, %s1021_s3, %s1022_s26  }
  0x2d   :  { %s1023_s29 = smov [#allocation10]   ;;  %s1024_s10 = smov [#allocation11]  }
  0x2e   :  { %s68_s30 = sshll.u32 %s1023_s29, 4  ;;  %s82_s11 = sshll.u32 %s1024_s10, 4  ;;  %s69_s30 = int_to_ptr.vmem [resolvable:$true] %s68_s30  ;;  %s83_s11 = int_to_ptr.vmem [resolvable:$true] %s82_s11 }
  0x2f   :  { %s955_s0 = scalar_lea.vmem %s69_s30, 4096  ;;  %p960_p7 = scmp.lt.s32.totalorder %s69_s30, %s69_s30 }
  0x30   :  { %p956_p6 = scmp.ne.s32.totalorder %s69_s30, %s955_s0  ;;  %p961_p8 = scmp.lt.s32.totalorder %s955_s0, %s955_s0 }
  0x32   :  { %p962_p9 = por %p961_p8, %p960_p7 }
  0x34   :  { %p963_p10 = pnand %p962_p9, %p956_p6 }
  0x36   :  { %966 = shalt.err (!%p963_p10)
}
  0x37   :  { %74 = dma.hbm_to_vmem [thread:$0]  %s1118_s5, 4096, %s69_s30, [#allocation9], %s1021_s3, %s1021_s3, %s1022_s26  }
  0x38   :  { %s975_s14 = scalar_lea.vmem %s83_s11, 2048  ;;  %p980_p12 = scmp.lt.s32.totalorder %s83_s11, %s83_s11 }
  0x39   :  { %p976_p11 = scmp.ne.s32.totalorder %s83_s11, %s975_s14  ;;  %p981_p13 = scmp.lt.s32.totalorder %s975_s14, %s975_s14 }
  0x3b   :  { %p982_p0 = por %p981_p13, %p980_p12 }
  0x3d   :  { %p983_p1 = pnand %p982_p0, %p976_p11 }
  0x3f   :  { %986 = shalt.err (!%p983_p1)
}
  0x40   :  { %s1025_s2 = smov 64   ;;  %s1026_s15 = smov 4  }
  0x41   :  { %88 = dma.hbm_to_vmem [thread:$0]  %s1120_s7, 2048, %s83_s11, [#allocation12], %s1025_s2, %s1025_s2, %s1026_s15  }
  0x42   :  { %1007 = dma.done.wait [#allocation3], 128  }
  0x43   :  { %1008 = vsyncadd [#allocation3], 4294967168 }
  0x44   :  { %1009 = dma.done.wait [#allocation6], 512  }
  0x45   :  { %1010 = vsyncadd [#allocation6], 4294966784 }
  0x46   :  { %1011 = dma.done.wait [#allocation9], 4224  }
  0x47   :  { %1012 = vsyncadd [#allocation9], 4294963072 }
  0x48   :  { %1013 = dma.done.wait [#allocation12], 2048  }
  0x49   :  { %1014 = vsyncadd [#allocation12], 4294965248  ;;  %v1027_v0 = vmov 0   ;;  %v117_v1 = vld [vmem:[#allocation8] sm:$0xff]  ;;  %vm127_vm0 = vcmask 1043456   ;;  %v116_v3 = vld [vmem:[#allocation7 + $0x10] sm:$0xff]  ;;  %v243_v59 = vlaneseq }
  0x4a   :  { %166 = vmatprep.mubr.bf16.mxu1 %v1027_v0  ;;  %v112_v2 = vld [vmem:[#allocation5] sm:$0xff]  ;;  %v704_v4 = vcombine.high %v117_v1, %v117_v1  ;;  %v703_v5 = vcombine.low %v117_v1, %v117_v1  ;;  %v710_v6 = vcombine.high %v116_v3, %v116_v3  ;;  %v709_v7 = vcombine.low %v116_v3, %v116_v3  ;;  %v806_v12 = vld [vmem:[#allocation10 + $0x64] ss:$8 sps:$4 sm:$0xff]   ;;  %v808_v15 = vld [vmem:[#allocation10 + $0x60] ss:$8 sps:$4 sm:$0xff]  }
  0x4b   :  { %v113_v9 = vpack.c.bf16 %v112_v2, %v112_v2  ;;  %v803_v10 = vld [vmem:[#allocation10 + $0x74] ss:$8 sps:$4 sm:$0xff]   ;;  %v805_v11 = vld [vmem:[#allocation10 + $0x70] ss:$8 sps:$4 sm:$0xff]   ;;  %vm123_vm1 = vcmask 64512   ;;  %vm190_vm2 = vcmask 195584  }
  0x4c   :  { %705 = vmatprep.subr.msk.bf16.mxu1 %vm127_vm0, %v704_v4  ;;  %v129_v8 = vsel %vm127_vm0, %v703_v5, 0  ;;  %v195_v13 = vsel %vm127_vm0, %v709_v7, 0  ;;  %v802_v14 = vld [vmem:[#allocation7 + $0x4] ss:$8 sps:$4 sm:$0xff]   ;;  %463 = vmatprep.subr.bf16.mxu0 %v803_v10  ;;  %v800_v16 = vld [vmem:[#allocation7] ss:$8 sps:$4 sm:$0xff]  }
  0x4d   :  { %149 = vmatpush1.bf16.msra.mxu1 %v129_v8  ;;  %464 = vmatpush1.bf16.msra.mxu0 %v805_v11  ;;  %v809_v17 = vld [vmem:[#allocation10 + $0x54] ss:$8 sps:$4 sm:$0xff]   ;;  %v811_v19 = vld [vmem:[#allocation10 + $0x50] ss:$8 sps:$4 sm:$0xff]   ;;  %v812_v21 = vld [vmem:[#allocation10 + $0x44] ss:$8 sps:$4 sm:$0xff]  }
  0x4e   :  { %711 = vmatprep.subr.msk.bf16.mxu1 %vm127_vm0, %v710_v6  ;;  %465 = vmatprep.subr.bf16.mxu0 %v806_v12  ;;  %v110_v18 = vld [vmem:[#allocation2] sm:$0xff]  ;;  %v814_v22 = vld [vmem:[#allocation10 + $0x40] ss:$8 sps:$4 sm:$0xff]   ;;  %v818_v25 = vld [vmem:[#allocation10 + $0x24] ss:$8 sps:$4 sm:$0xff]   ;;  %v244_v60 = vshrl.u32 %v243_v59, 7 }
  0x4f   :  { %v111_v20 = vpack.c.bf16 %v110_v18, %v110_v18  ;;  %v815_v23 = vld [vmem:[#allocation10 + $0x34] ss:$8 sps:$4 sm:$0xff]   ;;  %v817_v24 = vld [vmem:[#allocation10 + $0x30] ss:$8 sps:$4 sm:$0xff]   ;;  %v820_v26 = vld [vmem:[#allocation10 + $0x20] ss:$8 sps:$4 sm:$0xff]  }
  0x50   :  { %706 = vmatmul.mubr.msk.bf16.vlgmr.msra.gmra.mxu1 %vm123_vm1, %v113_v9  ;;  %v821_v27 = vld [vmem:[#allocation10 + $0x14] ss:$8 sps:$4 sm:$0xff]   ;;  %v823_v28 = vld [vmem:[#allocation10 + $0x10] ss:$8 sps:$4 sm:$0xff]   ;;  %v824_v29 = vld [vmem:[#allocation10 + $0x4] ss:$8 sps:$4 sm:$0xff]  }
  0x51   :  { %213 = vmatpush1.bf16.msra.mxu1 %v195_v13  ;;  %232 = vmatprep.mubr.bf16.mxu1 %v1027_v0  ;;  %v826_v30 = vld [vmem:[#allocation10] ss:$8 sps:$4 sm:$0xff]   ;;  %v827_v31 = vld [vmem:[#allocation10 + $0xf4] ss:$8 sps:$4 sm:$0xff]   ;;  %v829_v32 = vld [vmem:[#allocation10 + $0xf0] ss:$8 sps:$4 sm:$0xff]  }
  0x52   :  { %214 = vmatprep.subr.bf16.mxu1 %v802_v14  ;;  %466 = vmatpush1.bf16.msra.mxu0 %v808_v15  ;;  %v830_v33 = vld [vmem:[#allocation10 + $0xe4] ss:$8 sps:$4 sm:$0xff]   ;;  %v832_v34 = vld [vmem:[#allocation10 + $0xe0] ss:$8 sps:$4 sm:$0xff]   ;;  %v833_v35 = vld [vmem:[#allocation10 + $0xd4] ss:$8 sps:$4 sm:$0xff]  }
  0x53   :  { %467 = vmatprep.subr.bf16.mxu0 %v809_v17  ;;  %v835_v36 = vld [vmem:[#allocation10 + $0xd0] ss:$8 sps:$4 sm:$0xff]   ;;  %v836_v37 = vld [vmem:[#allocation10 + $0xc4] ss:$8 sps:$4 sm:$0xff]   ;;  %v838_v38 = vld [vmem:[#allocation10 + $0xc0] ss:$8 sps:$4 sm:$0xff]  }
  0x54   :  { %v839_v39 = vld [vmem:[#allocation10 + $0xb4] ss:$8 sps:$4 sm:$0xff]   ;;  %v841_v40 = vld [vmem:[#allocation10 + $0xb0] ss:$8 sps:$4 sm:$0xff]   ;;  %v842_v41 = vld [vmem:[#allocation10 + $0xa4] ss:$8 sps:$4 sm:$0xff]  }
  0x55   :  { %215 = vmatpush1.bf16.msra.mxu1 %v800_v16  ;;  %v844_v42 = vld [vmem:[#allocation10 + $0xa0] ss:$8 sps:$4 sm:$0xff]   ;;  %v845_v43 = vld [vmem:[#allocation10 + $0x94] ss:$8 sps:$4 sm:$0xff]   ;;  %v847_v44 = vld [vmem:[#allocation10 + $0x90] ss:$8 sps:$4 sm:$0xff]  }
  0x56   :  { %468 = vmatpush1.bf16.msra.mxu0 %v811_v19  ;;  %v848_v45 = vld [vmem:[#allocation10 + $0x84] ss:$8 sps:$4 sm:$0xff]   ;;  %v850_v46 = vld [vmem:[#allocation10 + $0x80] ss:$8 sps:$4 sm:$0xff]   ;;  %v851_v47 = vld [vmem:[#allocation11 + $0x78] sm:$0xff]   ;;  %v245_v63 = vsub.s32 0, %v244_v60 }
  0x57   :  { %469 = vmatprep.subr.bf16.mxu0 %v812_v21  ;;  %v852_v48 = vld [vmem:[#allocation11 + $0x38] sm:$0xff]   ;;  %v853_v49 = vld [vmem:[#allocation11 + $0x70] sm:$0xff]   ;;  %762 = vmatprep.subr.bf16.mxu1 %v851_v47  ;;  %v855_v51 = vld [vmem:[#allocation11 + $0x68] sm:$0xff]   ;;  %v249_v2 = vsub.s32 1, %v244_v60 }
  0x58   :  { %712 = vmatmul.mubr.msk.bf16.vlgmr.msra.gmra.mxu1 %vm190_vm2, %v111_v20  ;;  %v854_v50 = vld [vmem:[#allocation11 + $0x30] sm:$0xff]   ;;  %v856_v52 = vld [vmem:[#allocation11 + $0x28] sm:$0xff]   ;;  %v857_v53 = vld [vmem:[#allocation11 + $0x60] sm:$0xff]  }
  0x59   :  { %763 = vmatpush3.bf16.msra.mxu1 %v852_v48  ;;  %v858_v54 = vld [vmem:[#allocation11 + $0x20] sm:$0xff]   ;;  %v859_v55 = vld [vmem:[#allocation11 + $0x58] sm:$0xff]   ;;  %v861_v57 = vld [vmem:[#allocation11 + $0x50] sm:$0xff]  }
  0x5a   :  { %470 = vmatpush1.bf16.msra.mxu0 %v814_v22  ;;  %764 = vmatprep.subr.bf16.mxu1 %v853_v49  ;;  %v860_v56 = vld [vmem:[#allocation11 + $0x18] sm:$0xff]   ;;  %v862_v58 = vld [vmem:[#allocation11 + $0x10] sm:$0xff]   ;;  %v863_v18 = vld [vmem:[#allocation11 + $0x48] sm:$0xff]  }
  0x5b   :  { %471 = vmatprep.subr.bf16.mxu0 %v815_v23  ;;  %v241_v1 = vld [vmem:[%s1117_s4] sm:$0x3]  ;;  %v864_v19 = vld [vmem:[#allocation11 + $0x8] sm:$0xff]   ;;  %v865_v20 = vld [vmem:[#allocation11 + $0x40] sm:$0xff]  }
  0x5c   :  { %v246_v4 = vrot.slane %v241_v1, %v245_v63  ;;  %v250_v7 = vrot.slane %v241_v1, %v249_v2  ;;  %v866_v21 = vld [vmem:[#allocation11] sm:$0xff]   ;;  %v291_v22 = vld [vmem:[%s1119_s6] sm:$0x3]  ;;  %s1028_s6 = smov [#allocation13]  }
  0x5d   :  { %765 = vmatpush3.bf16.msra.mxu1 %v854_v50  ;;  %v296_v23 = vrot.slane %v291_v22, %v245_v63  ;;  %s691_s21 = sshll.u32 %s1028_s6, 4  ;;  %s692_s21 = int_to_ptr.vmem [resolvable:$true] %s691_s21 }
  0x5e   :  { %472 = vmatpush1.bf16.msra.mxu0 %v817_v24  ;;  %766 = vmatprep.subr.bf16.mxu1 %v855_v51  ;;  %v300_v24 = vrot.slane %v291_v22, %v249_v2  ;;  %s987_s22 = scalar_lea.vmem %s692_s21, 64  ;;  %p992_p3 = scmp.lt.s32.totalorder %s692_s21, %s692_s21 }
  0x5f   :  { %473 = vmatprep.subr.bf16.mxu0 %v818_v25  ;;  %p988_p2 = scmp.ne.s32.totalorder %s692_s21, %s987_s22  ;;  %p993_p4 = scmp.lt.s32.totalorder %s987_s22, %s987_s22 }
  0x61   :  { %767 = vmatpush3.bf16.msra.mxu1 %v856_v52  ;;  %p994_p5 = por %p993_p4, %p992_p3 }
  0x62   :  { %474 = vmatpush1.bf16.msra.mxu0 %v820_v26  ;;  %768 = vmatprep.subr.bf16.mxu1 %v857_v53 }
  0x63   :  { %475 = vmatprep.subr.bf16.mxu0 %v821_v27  ;;  %p995_p6 = pnand %p994_p5, %p988_p2 }
  0x65   :  { %769 = vmatpush3.bf16.msra.mxu1 %v858_v54 }
  0x66   :  { %476 = vmatpush1.bf16.msra.mxu0 %v823_v28  ;;  %770 = vmatprep.subr.bf16.mxu1 %v859_v55 }
  0x67   :  { %477 = vmatprep.subr.bf16.mxu0 %v824_v29 }
  0x69   :  { %771 = vmatpush3.bf16.msra.mxu1 %v860_v56 }
  0x6a   :  { %478 = vmatpush1.bf16.msra.mxu0 %v826_v30  ;;  %772 = vmatprep.subr.bf16.mxu1 %v861_v57 }
  0x6b   :  { %479 = vmatprep.subr.bf16.mxu0 %v827_v31 }
  0x6d   :  { %773 = vmatpush3.bf16.msra.mxu1 %v862_v58 }
  0x6e   :  { %480 = vmatpush2.bf16.msra.mxu0 %v829_v32  ;;  %774 = vmatprep.subr.bf16.mxu1 %v863_v18 }
  0x6f   :  { %481 = vmatprep.subr.bf16.mxu0 %v830_v33 }
  0x71   :  { %775 = vmatpush3.bf16.msra.mxu1 %v864_v19 }
  0x72   :  { %482 = vmatpush2.bf16.msra.mxu0 %v832_v34  ;;  %776 = vmatprep.subr.bf16.mxu1 %v865_v20 }
  0x73   :  { %483 = vmatprep.subr.bf16.mxu0 %v833_v35 }
  0x75   :  { %777 = vmatpush3.bf16.msra.mxu1 %v866_v21 }
  0x76   :  { %484 = vmatpush2.bf16.msra.mxu0 %v835_v36  ;;  %v745_v36 = vld [vmem:[%s1121_s8] ss:$0 sm:$0xff] }
  0x77   :  { %485 = vmatprep.subr.bf16.mxu0 %v836_v37 }
  0x7a   :  { %486 = vmatpush2.bf16.msra.mxu0 %v838_v38 }
  0x7b   :  { %487 = vmatprep.subr.bf16.mxu0 %v839_v39 }
  0x7e   :  { %488 = vmatpush2.bf16.msra.mxu0 %v841_v40 }
  0x7f   :  { %489 = vmatprep.subr.bf16.mxu0 %v842_v41 }
  0x82   :  { %490 = vmatpush2.bf16.msra.mxu0 %v844_v42 }
  0x83   :  { %491 = vmatprep.subr.bf16.mxu0 %v845_v43 }
  0x86   :  { %492 = vmatpush2.bf16.msra.mxu0 %v847_v44 }
  0x87   :  { %493 = vmatprep.subr.bf16.mxu0 %v848_v45 }
  0x8a   :  { %494 = vmatpush2.bf16.msra.mxu0 %v850_v46 }
 0x110   :  { %v168_v61 = vpop.f32.mrf.mxu1 }
 0x112   :  { %v170_v62 = vpop.f32.mrf.mxu1 }
 0x114   :  { %v172_v0 = vpop.f32.mrf.mxu1 }
 0x116   :  { %v173_v3 = vpop.f32.mrf.mxu1 }
 0x118   :  { %v234_v5 = vpop.f32.mrf.mxu1 }
 0x119   :  { %v235_v6 = vadd.f32 %v234_v5, %v168_v61 }
 0x11a   :  { %v236_v8 = vpop.f32.mrf.mxu1 }
 0x11b   :  { %v253_v9 = vadd.f32 %v246_v4, %v235_v6  ;;  %v237_v10 = vadd.f32 %v236_v8, %v170_v62 }
 0x11c   :  { %v238_v11 = vpop.f32.mrf.mxu1 }
 0x11d   :  { %v254_v12 = vadd.f32 %v250_v7, %v237_v10  ;;  %v255_v13 = vmax.f32 %v253_v9, 0.0 }
 0x11e   :  { %v239_v14 = vpop.f32.mrf.mxu1 }
 0x11f   :  { %v256_v15 = vmax.f32 %v254_v12, 0.0  ;;  %v257_v17 = vpack.c.bf16 %v255_v13, %v255_v13 }
 0x121   :  { %v258_v16 = vpack.c.bf16 %v256_v15, %v256_v15 }
 0x123   :  { %495 = vmatprep.mubr.bf16.mxu0 %v258_v16 }
 0x124   :  { %496 = vmatmul.mubr.bf16.vlgmr.msra.gmra.mxu0 %v257_v17 }
 0x1e4   :  { %v497_v25 = vpop.f32.mrf.mxu0 }
 0x1e5   :  { %v498_v26 = vadd.f32 %v497_v25, %v296_v23 }
 0x1e6   :  { %v499_v27 = vpop.f32.mrf.mxu0 }
 0x1e7   :  { %v500_v28 = vadd.f32 %v499_v27, %v300_v24  ;;  %v504_v29 = vmax.f32 %v498_v26, 0.0 }
 0x1e8   :  { %v501_v30 = vpop.f32.mrf.mxu0 }
 0x1e9   :  { %v505_v31 = vmax.f32 %v500_v28, 0.0  ;;  %v506_v34 = vpack.c.bf16 %v504_v29, %v504_v29 }
 0x1ea   :  { %v502_v32 = vpop.f32.mrf.mxu0 }
 0x1eb   :  { %v507_v33 = vpack.c.bf16 %v505_v31, %v505_v31 }
 0x1ed   :  { %675 = vmatprep.mubr.bf16.mxu1 %v507_v33 }
 0x1ee   :  { %676 = vmatmul.mubr.bf16.vlgmr.msra.gmra.mxu1 %v506_v34 }
 0x2ae   :  { %v778_v35 = vpop.f32.mrf.mxu1 }
 0x2b0   :  { %v779_v37 = vpop.f32.mrf.mxu1 }
 0x2b1   :  { %v780_v38 = vadd.f32 %v779_v37, %v778_v35 }
 0x2b2   :  { %v781_v39 = vpop.f32.mrf.mxu1 }
 0x2b3   :  { %v678_v40 = vadd.f32 %v780_v38, %v745_v36 }
 0x2b4   :  { %v782_v41 = vpop.f32.mrf.mxu1 }
 0x2b5   :  { %v683_v42 = vpack.c.bf16 %v678_v40, %v678_v40 }
 0x2b7   :  { %684 = vst [vmem:[#allocation13] sm:$0xf] %v683_v42 }
 0x2b8   :  { %998 = shalt.err (!%p995_p6)
}
 0x2b9   :  { %694 = dma.vmem_to_hbm [thread:$0]  %s692_s21, 64, %s1122_s9, [#allocation4]  }
 0x2ba   :  { %1015 = dma.done.wait [#allocation4], 64  }
 0x2bb   :  { %1016 = vsyncadd [#allocation4], 4294967232 }
 0x2bc   :  { %698 = vsyncpa [#allocation3], 1 }
 0x2bd   :  { %699 = vsyncpa [#allocation6], 1 }
 0x2be   :  { %700 = vsyncpa [#allocation9], 1 }
 0x2bf   :  { %701 = vsyncpa [#allocation12], 1 }
 0x2c0   :  { %702 = vsyncpa [#allocation4], 1 }

</bundles_post_ra>
